<compile_context>
chip_gen: v7x
topology: tpu7x:2x2x1
jax: 0.10.0
libtpu: 0.0.40
codegen_flags: <defaults>
</compile_context>

<pallas_src>
import jax
import jax.numpy as jnp
import numpy as np
from jax.experimental import pallas as pl
from jax.experimental.pallas import tpu as pltpu

HIDDEN = 32
N = 2 * HIDDEN          # 64  : attention feature width
GATES = 4 * HIDDEN      # 128 : LSTM gate width

# ---- slab A layout (128 lanes wide) ----------------------------------------
A_WGATE = 0              # rows [0,128): fused gate matrix (h rows | zero c rows | embed row)
A_BIAS = GATES           # row 128     : b_ih + b_hh
A_SCALE = GATES + 1      # row 129     : per-lane gate pre-scale for the single tanh
SLAB_A_ROWS = 136        # padded to a multiple of 8 sublanes

# ---- slab B layout (64 lanes wide) ------------------------------------------
B_WD = 0                 # rows [0,64)   : decode_proj.weight.T
B_W1HC = N               # rows [64,128) : out_1.weight.T rows for [h; c]
B_W1CTX = 2 * N          # rows [128,192): out_1.weight.T rows for context
B_BD = 3 * N             # row 192       : decode_proj.bias
B_VW = 3 * N + 1         # row 193       : v.weight
B_B1 = 3 * N + 2         # row 194       : out_1.bias
B_W2 = 3 * N + 3         # row 195       : out_2.weight
B_B2 = 3 * N + 4         # row 196       : out_2.bias (broadcast over lanes)
SLAB_B_ROWS = 200


def decoder_kernel(state_ref, enc_out_ref, enc_feat_ref, sa_ref, sb_ref, out_ref):
    B = state_ref.shape[0]

    state = state_ref[...]                                   # (B,128): [h | c | embed...]

    # ---------------- LSTM cell: one MXU matmul + one full-vreg tanh ---------
    w_gate = sa_ref[0:GATES, :]                              # (128, 128)
    b_lstm = sa_ref[A_BIAS:A_BIAS + 1, :]                    # (1, 128)
    g_scale = sa_ref[A_SCALE:A_SCALE + 1, :]                 # (1, 128)

    gates = jnp.dot(state, w_gate, preferred_element_type=jnp.float32) + b_lstm
    # sigmoid(x) = 0.5*(tanh(x/2)+1) exactly; pre-scaling the gates per lane
    # lets all four activations ride a single EUP tanh push on (B,128).
    t = jnp.tanh(gates * g_scale)
    i_g = 0.5 * (t[:, 0:HIDDEN] + 1.0)
    f_g = 0.5 * (t[:, HIDDEN:2 * HIDDEN] + 1.0)
    g_g = t[:, 2 * HIDDEN:3 * HIDDEN]
    o_g = 0.5 * (t[:, 3 * HIDDEN:4 * HIDDEN] + 1.0)

    c_prev = state[:, HIDDEN:2 * HIDDEN]
    c_new = f_g * c_prev + i_g * g_g
    h_new = o_g * jnp.tanh(c_new)
    hc = jnp.concatenate([h_new, c_new], axis=1)             # (B,64) == s_t_hat

    # ---------------- Attention (sublane-domain, no MXU padding) -------------
    wd = sb_ref[B_WD:B_WD + N, :]                            # (64, 64)
    bd = sb_ref[B_BD:B_BD + 1, :]                            # (1, 64)
    vw = sb_ref[B_VW:B_VW + 1, :]                            # (1, 64)

    dec_fea = jnp.dot(hc, wd, preferred_element_type=jnp.float32) + bd   # (B,64)
    att = jnp.tanh(enc_feat_ref[...] + dec_fea[:, None, :])              # (B,T,64)
    scores = jnp.sum(att * vw[None, :, :], axis=-1, keepdims=True)       # (B,T,1)

    m = jnp.max(scores, axis=1, keepdims=True)                           # (B,1,1)
    ex = jnp.exp(scores - m)                                             # (B,T,1)
    denom = jnp.sum(ex, axis=1)                                          # (B,1)
    # context: VPU multiply + sublane reduce; normalize once at the end.
    num = jnp.sum(ex * enc_out_ref[...], axis=1)                         # (B,64)
    c_ctx = num * pl.reciprocal(denom, approx=False)                     # (B,64)

    # ---------------- Output head (weights pre-split: no concat) -------------
    w1_hc = sb_ref[B_W1HC:B_W1HC + N, :]                     # (64, 64)
    w1_cx = sb_ref[B_W1CTX:B_W1CTX + N, :]                   # (64, 64)
    b1 = sb_ref[B_B1:B_B1 + 1, :]                            # (1, 64)
    w2 = sb_ref[B_W2:B_W2 + 1, :]                            # (1, 64)
    b2 = sb_ref[B_B2:B_B2 + 1, :]                            # (1, 64), all = out_2.bias

    out1 = (jnp.dot(hc, w1_hc, preferred_element_type=jnp.float32)
            + jnp.dot(c_ctx, w1_cx, preferred_element_type=jnp.float32)
            + b1)                                                        # (B,64)
    out2 = jnp.sum(out1 * w2, axis=-1, keepdims=True)                    # (B,1)

    # Single lane-dense (B,128) store: lanes [0:32]=h, [32:64]=c, [64:]=out.
    out_tail = jnp.broadcast_to(out2, (B, N)) + b2                       # (B,64)
    out_ref[...] = jnp.concatenate([hc, out_tail], axis=1)


def prepare_params(raw):
    """One-time host-side layout prep: pack all weights/biases into two slabs
    so the per-step kernel issues 2 weight DMAs instead of 11."""
    w_hh_t = raw["lstm_w_hh"].T                              # (32, 128)
    w_ih_row = raw["lstm_w_ih"].reshape(1, GATES)            # (1, 128)
    b_lstm = (raw["lstm_b_ih"] + raw["lstm_b_hh"]).reshape(GATES)
    gate_scale = jnp.concatenate(
        [jnp.full((2 * HIDDEN,), 0.5, jnp.float32),          # i, f -> sigmoid
         jnp.full((HIDDEN,), 1.0, jnp.float32),              # g    -> tanh
         jnp.full((HIDDEN,), 0.5, jnp.float32)])             # o    -> sigmoid

    slab_a = jnp.zeros((SLAB_A_ROWS, GATES), jnp.float32)
    slab_a = slab_a.at[0:HIDDEN, :].set(w_hh_t)              # h rows
    # rows [32,64) stay zero: the cell state does not feed the gates.
    slab_a = slab_a.at[2 * HIDDEN:2 * HIDDEN + 1, :].set(w_ih_row)  # embed row
    slab_a = slab_a.at[A_BIAS, :].set(b_lstm)
    slab_a = slab_a.at[A_SCALE, :].set(gate_scale)

    w1_t = raw["out1_w"].T                                   # (128, 64)
    slab_b = jnp.zeros((SLAB_B_ROWS, N), jnp.float32)
    slab_b = slab_b.at[B_WD:B_WD + N, :].set(raw["decode_proj_w"].T)
    slab_b = slab_b.at[B_W1HC:B_W1HC + N, :].set(w1_t[0:N])
    slab_b = slab_b.at[B_W1CTX:B_W1CTX + N, :].set(w1_t[N:2 * N])
    slab_b = slab_b.at[B_BD, :].set(raw["decode_proj_b"])
    slab_b = slab_b.at[B_VW, :].set(raw["v_w"].reshape(N))
    slab_b = slab_b.at[B_B1, :].set(raw["out1_b"])
    slab_b = slab_b.at[B_W2, :].set(raw["out2_w"].reshape(N))
    slab_b = slab_b.at[B_B2, :].set(jnp.full((N,), raw["out2_b"][0]))
    return {"slab_a": slab_a, "slab_b": slab_b}


def decoder_forward(y_t_1_embed, s_t_1, encoder_outputs, encoder_feature, prepared):
    h0, c0 = s_t_1                                           # each (1, B, HIDDEN)
    B, T, n = encoder_outputs.shape
    enc_feat3 = encoder_feature.reshape(B, T, n)

    # Lane-dense packed state: [h0 | c0 | embed broadcast].  The gate matrix's
    # embed rows are zero except row 64, so the broadcast copies are harmless.
    state = jnp.concatenate(
        [h0.reshape(B, HIDDEN), c0.reshape(B, HIDDEN),
         jnp.broadcast_to(y_t_1_embed.astype(jnp.float32), (B, N))], axis=1)

    packed = pl.pallas_call(
        decoder_kernel,
        out_shape=jax.ShapeDtypeStruct((B, GATES), jnp.float32),
        in_specs=[pl.BlockSpec(memory_space=pltpu.MemorySpace.VMEM)
                  for _ in range(5)],
        out_specs=pl.BlockSpec(memory_space=pltpu.MemorySpace.VMEM),
    )(state, encoder_outputs, enc_feat3, prepared["slab_a"], prepared["slab_b"])

    h_new = packed[:, 0:HIDDEN]
    c_new = packed[:, HIDDEN:2 * HIDDEN]
    output = packed[:, 2 * HIDDEN:2 * HIDDEN + 1]
    return output, (h_new.reshape(1, B, HIDDEN), c_new.reshape(1, B, HIDDEN))


def reference_decoder(y_t_1_embed, s_t_1, encoder_outputs, encoder_feature, raw):
    """Pure-JAX reference mirroring the PyTorch Decoder.forward."""
    h0, c0 = s_t_1
    B, T, n = encoder_outputs.shape
    h0 = h0.reshape(B, HIDDEN)
    c0 = c0.reshape(B, HIDDEN)

    gates = (y_t_1_embed @ raw["lstm_w_ih"].T + raw["lstm_b_ih"]
             + h0 @ raw["lstm_w_hh"].T + raw["lstm_b_hh"])
    i_g, f_g, g_g, o_g = jnp.split(gates, 4, axis=1)
    i_g = jax.nn.sigmoid(i_g)
    f_g = jax.nn.sigmoid(f_g)
    g_g = jnp.tanh(g_g)
    o_g = jax.nn.sigmoid(o_g)
    c_new = f_g * c0 + i_g * g_g
    h_new = o_g * jnp.tanh(c_new)
    s_t_hat = jnp.concatenate([h_new, c_new], axis=1)

    dec_fea = s_t_hat @ raw["decode_proj_w"].T + raw["decode_proj_b"]
    dec_fea_expanded = jnp.broadcast_to(dec_fea[:, None, :], (B, T, n)).reshape(-1, n)
    e = jnp.tanh(encoder_feature + dec_fea_expanded)
    scores = (e @ raw["v_w"].T).reshape(B, T)
    attn = jax.nn.softmax(scores, axis=-1)
    c_ctx = jnp.einsum("bt,btn->bn", attn, encoder_outputs)

    out_input = jnp.concatenate([s_t_hat, c_ctx], axis=1)
    out = out_input @ raw["out1_w"].T + raw["out1_b"]
    out = out @ raw["out2_w"].T + raw["out2_b"]
    return out, (h_new.reshape(1, B, HIDDEN), c_new.reshape(1, B, HIDDEN))


if __name__ == "__main__":
    key = jax.random.PRNGKey(0)
    ks = jax.random.split(key, 16)
    B, T = 2, 8

    def uinit(k, shape, fan_in):
        bound = 1.0 / np.sqrt(fan_in)
        return jax.random.uniform(k, shape, jnp.float32, -bound, bound)

    raw = {
        "lstm_w_ih": uinit(ks[0], (GATES, 1), HIDDEN),
        "lstm_w_hh": uinit(ks[1], (GATES, HIDDEN), HIDDEN),
        "lstm_b_ih": uinit(ks[2], (GATES,), HIDDEN),
        "lstm_b_hh": uinit(ks[3], (GATES,), HIDDEN),
        "decode_proj_w": uinit(ks[4], (N, N), N),
        "decode_proj_b": uinit(ks[5], (N,), N),
        "v_w": uinit(ks[6], (1, N), N),
        "out1_w": uinit(ks[7], (N, 2 * N), 2 * N),
        "out1_b": uinit(ks[8], (N,), 2 * N),
        "out2_w": uinit(ks[9], (1, N), N),
        "out2_b": uinit(ks[10], (1,), N),
    }

    y_t_1_embed = jax.random.normal(ks[11], (B, 1), jnp.float32)
    h0 = jax.random.normal(ks[12], (1, B, HIDDEN), jnp.float32)
    c0 = jax.random.normal(ks[13], (1, B, HIDDEN), jnp.float32)
    encoder_outputs = jax.random.normal(ks[14], (B, T, N), jnp.float32)
    encoder_feature = jax.random.normal(ks[15], (B * T, N), jnp.float32)

    prepared = prepare_params(raw)
    output, (h_new, c_new) = decoder_forward(
        y_t_1_embed, (h0, c0), encoder_outputs, encoder_feature, prepared)
    output, h_new, c_new = jax.block_until_ready((output, h_new, c_new))

    out_ref, (h_ref, c_ref) = reference_decoder(
        y_t_1_embed, (h0, c0), encoder_outputs, encoder_feature, raw)

    np.testing.assert_allclose(np.asarray(h_new), np.asarray(h_ref), rtol=1e-5, atol=2e-5)
    np.testing.assert_allclose(np.asarray(c_new), np.asarray(c_ref), rtol=1e-5, atol=2e-5)
    np.testing.assert_allclose(np.asarray(output), np.asarray(out_ref), rtol=1e-5, atol=2e-5)

    print("KERNEL_OK")
</pallas_src>

<mosaic_0001>
module attributes {stable_mosaic.version = 11 : i64} {
  func.func @decoder_kernel(%arg0: memref<2x128xf32, #tpu.memory_space<vmem>>, %arg1: memref<2x8x64xf32, #tpu.memory_space<vmem>>, %arg2: memref<2x8x64xf32, #tpu.memory_space<vmem>>, %arg3: memref<136x128xf32, #tpu.memory_space<vmem>>, %arg4: memref<200x64xf32, #tpu.memory_space<vmem>>, %arg5: memref<2x128xf32, #tpu.memory_space<vmem>>) attributes {dimension_semantics = [], scalar_prefetch = 0 : i64, scratch_operands = 0 : i64, tpu.core_type = #tpu.core_type<tc>} {
    %c0 = arith.constant 0 : index
    %c0_0 = arith.constant 0 : index
    %0 = vector.load %arg0[%c0, %c0_0] : memref<2x128xf32, #tpu.memory_space<vmem>>, vector<2x128xf32>
    %c0_1 = arith.constant 0 : index
    %c0_2 = arith.constant 0 : index
    %1 = vector.load %arg3[%c0_1, %c0_2] : memref<136x128xf32, #tpu.memory_space<vmem>>, vector<128x128xf32>
    %c128 = arith.constant 128 : index
    %c0_3 = arith.constant 0 : index
    %2 = vector.load %arg3[%c128, %c0_3] : memref<136x128xf32, #tpu.memory_space<vmem>>, vector<1x128xf32>
    %c129 = arith.constant 129 : index
    %c0_4 = arith.constant 0 : index
    %3 = vector.load %arg3[%c129, %c0_4] : memref<136x128xf32, #tpu.memory_space<vmem>>, vector<1x128xf32>
    %cst = arith.constant dense<0.000000e+00> : vector<2x128xf32>
    %4 = tpu.matmul %0, %1, %cst {dimension_numbers = #tpu.dot_dimension_numbers<[1], [0], [0], [1], [0, 0, 1, 1], [], []>} : vector<2x128xf32>, vector<128x128xf32>, vector<2x128xf32> -> vector<2x128xf32>
    %5 = vector.broadcast %2 : vector<1x128xf32> to vector<2x128xf32>
    %6 = arith.addf %4, %5 : vector<2x128xf32>
    %7 = vector.broadcast %3 : vector<1x128xf32> to vector<2x128xf32>
    %8 = arith.mulf %6, %7 : vector<2x128xf32>
    %9 = math.tanh %8 : vector<2x128xf32>
    %10 = vector.extract_strided_slice %9 {offsets = [0, 0], sizes = [2, 32], strides = [1, 1]} : vector<2x128xf32> to vector<2x32xf32>
    %cst_5 = arith.constant 1.000000e+00 : f32
    %11 = vector.broadcast %cst_5 : f32 to vector<2x32xf32>
    %12 = arith.addf %10, %11 : vector<2x32xf32>
    %cst_6 = arith.constant 5.000000e-01 : f32
    %13 = vector.broadcast %cst_6 : f32 to vector<2x32xf32>
    %14 = arith.mulf %13, %12 : vector<2x32xf32>
    %15 = vector.extract_strided_slice %9 {offsets = [0, 32], sizes = [2, 32], strides = [1, 1]} : vector<2x128xf32> to vector<2x32xf32>
    %cst_7 = arith.constant 1.000000e+00 : f32
    %16 = vector.broadcast %cst_7 : f32 to vector<2x32xf32>
    %17 = arith.addf %15, %16 : vector<2x32xf32>
    %cst_8 = arith.constant 5.000000e-01 : f32
    %18 = vector.broadcast %cst_8 : f32 to vector<2x32xf32>
    %19 = arith.mulf %18, %17 : vector<2x32xf32>
    %20 = vector.extract_strided_slice %9 {offsets = [0, 64], sizes = [2, 32], strides = [1, 1]} : vector<2x128xf32> to vector<2x32xf32>
    %21 = vector.extract_strided_slice %9 {offsets = [0, 96], sizes = [2, 32], strides = [1, 1]} : vector<2x128xf32> to vector<2x32xf32>
    %cst_9 = arith.constant 1.000000e+00 : f32
    %22 = vector.broadcast %cst_9 : f32 to vector<2x32xf32>
    %23 = arith.addf %21, %22 : vector<2x32xf32>
    %cst_10 = arith.constant 5.000000e-01 : f32
    %24 = vector.broadcast %cst_10 : f32 to vector<2x32xf32>
    %25 = arith.mulf %24, %23 : vector<2x32xf32>
    %26 = vector.extract_strided_slice %0 {offsets = [0, 32], sizes = [2, 32], strides = [1, 1]} : vector<2x128xf32> to vector<2x32xf32>
    %27 = arith.mulf %19, %26 : vector<2x32xf32>
    %28 = arith.mulf %14, %20 : vector<2x32xf32>
    %29 = arith.addf %27, %28 : vector<2x32xf32>
    %30 = math.tanh %29 : vector<2x32xf32>
    %31 = arith.mulf %25, %30 : vector<2x32xf32>
    %32 = tpu.concatenate %31, %29 in 1 : vector<2x32xf32>, vector<2x32xf32> -> vector<2x64xf32>
    %c0_11 = arith.constant 0 : index
    %c0_12 = arith.constant 0 : index
    %33 = vector.load %arg4[%c0_11, %c0_12] : memref<200x64xf32, #tpu.memory_space<vmem>>, vector<64x64xf32>
    %c192 = arith.constant 192 : index
    %c0_13 = arith.constant 0 : index
    %34 = vector.load %arg4[%c192, %c0_13] : memref<200x64xf32, #tpu.memory_space<vmem>>, vector<1x64xf32>
    %c193 = arith.constant 193 : index
    %c0_14 = arith.constant 0 : index
    %35 = vector.load %arg4[%c193, %c0_14] : memref<200x64xf32, #tpu.memory_space<vmem>>, vector<1x64xf32>
    %cst_15 = arith.constant dense<0.000000e+00> : vector<2x64xf32>
    %36 = tpu.matmul %32, %33, %cst_15 {dimension_numbers = #tpu.dot_dimension_numbers<[1], [0], [0], [1], [0, 0, 1, 1], [], []>} : vector<2x64xf32>, vector<64x64xf32>, vector<2x64xf32> -> vector<2x64xf32>
    %37 = vector.broadcast %34 : vector<1x64xf32> to vector<2x64xf32>
    %38 = arith.addf %36, %37 : vector<2x64xf32>
    %c0_16 = arith.constant 0 : index
    %c0_17 = arith.constant 0 : index
    %c0_18 = arith.constant 0 : index
    %39 = vector.load %arg2[%c0_16, %c0_17, %c0_18] : memref<2x8x64xf32, #tpu.memory_space<vmem>>, vector<2x8x64xf32>
    %40 = vector.shape_cast %38 : vector<2x64xf32> to vector<2x1x64xf32>
    %41 = vector.broadcast %40 : vector<2x1x64xf32> to vector<2x8x64xf32>
    %42 = arith.addf %39, %41 : vector<2x8x64xf32>
    %43 = math.tanh %42 : vector<2x8x64xf32>
    %44 = vector.shape_cast %35 : vector<1x64xf32> to vector<1x1x64xf32>
    %45 = vector.broadcast %44 : vector<1x1x64xf32> to vector<2x8x64xf32>
    %46 = arith.mulf %43, %45 : vector<2x8x64xf32>
    %cst_19 = arith.constant dense<0.000000e+00> : vector<2x8xf32>
    %47 = vector.multi_reduction <add>, %46, %cst_19 [2] : vector<2x8x64xf32> to vector<2x8xf32>
    %48 = vector.shape_cast %47 : vector<2x8xf32> to vector<2x8x1xf32>
    %cst_20 = arith.constant dense<0xFF800000> : vector<2x1xf32>
    %49 = vector.multi_reduction <maximumf>, %48, %cst_20 [1] : vector<2x8x1xf32> to vector<2x1xf32>
    %50 = vector.shape_cast %49 : vector<2x1xf32> to vector<2x1x1xf32>
    %51 = vector.broadcast %50 : vector<2x1x1xf32> to vector<2x8x1xf32>
    %52 = arith.subf %48, %51 : vector<2x8x1xf32>
    %53 = math.exp %52 : vector<2x8x1xf32>
    %cst_21 = arith.constant dense<0.000000e+00> : vector<2x1xf32>
    %54 = vector.multi_reduction <add>, %53, %cst_21 [1] : vector<2x8x1xf32> to vector<2x1xf32>
    %c0_22 = arith.constant 0 : index
    %c0_23 = arith.constant 0 : index
    %c0_24 = arith.constant 0 : index
    %55 = vector.load %arg1[%c0_22, %c0_23, %c0_24] : memref<2x8x64xf32, #tpu.memory_space<vmem>>, vector<2x8x64xf32>
    %56 = vector.broadcast %53 : vector<2x8x1xf32> to vector<2x8x64xf32>
    %57 = arith.mulf %56, %55 : vector<2x8x64xf32>
    %cst_25 = arith.constant dense<0.000000e+00> : vector<2x64xf32>
    %58 = vector.multi_reduction <add>, %57, %cst_25 [1] : vector<2x8x64xf32> to vector<2x64xf32>
    %59 = tpu.reciprocal %54 : vector<2x1xf32> -> vector<2x1xf32>
    %60 = vector.broadcast %59 : vector<2x1xf32> to vector<2x64xf32>
    %61 = arith.mulf %58, %60 : vector<2x64xf32>
    %c64 = arith.constant 64 : index
    %c0_26 = arith.constant 0 : index
    %62 = vector.load %arg4[%c64, %c0_26] : memref<200x64xf32, #tpu.memory_space<vmem>>, vector<64x64xf32>
    %c128_27 = arith.constant 128 : index
    %c0_28 = arith.constant 0 : index
    %63 = vector.load %arg4[%c128_27, %c0_28] : memref<200x64xf32, #tpu.memory_space<vmem>>, vector<64x64xf32>
    %c194 = arith.constant 194 : index
    %c0_29 = arith.constant 0 : index
    %64 = vector.load %arg4[%c194, %c0_29] : memref<200x64xf32, #tpu.memory_space<vmem>>, vector<1x64xf32>
    %c195 = arith.constant 195 : index
    %c0_30 = arith.constant 0 : index
    %65 = vector.load %arg4[%c195, %c0_30] : memref<200x64xf32, #tpu.memory_space<vmem>>, vector<1x64xf32>
    %c196 = arith.constant 196 : index
    %c0_31 = arith.constant 0 : index
    %66 = vector.load %arg4[%c196, %c0_31] : memref<200x64xf32, #tpu.memory_space<vmem>>, vector<1x64xf32>
    %cst_32 = arith.constant dense<0.000000e+00> : vector<2x64xf32>
    %67 = tpu.matmul %32, %62, %cst_32 {dimension_numbers = #tpu.dot_dimension_numbers<[1], [0], [0], [1], [0, 0, 1, 1], [], []>} : vector<2x64xf32>, vector<64x64xf32>, vector<2x64xf32> -> vector<2x64xf32>
    %cst_33 = arith.constant dense<0.000000e+00> : vector<2x64xf32>
    %68 = tpu.matmul %61, %63, %cst_33 {dimension_numbers = #tpu.dot_dimension_numbers<[1], [0], [0], [1], [0, 0, 1, 1], [], []>} : vector<2x64xf32>, vector<64x64xf32>, vector<2x64xf32> -> vector<2x64xf32>
    %69 = arith.addf %67, %68 : vector<2x64xf32>
    %70 = vector.broadcast %64 : vector<1x64xf32> to vector<2x64xf32>
    %71 = arith.addf %69, %70 : vector<2x64xf32>
    %72 = vector.broadcast %65 : vector<1x64xf32> to vector<2x64xf32>
    %73 = arith.mulf %71, %72 : vector<2x64xf32>
    %cst_34 = arith.constant dense<0.000000e+00> : vector<2xf32>
    %74 = vector.multi_reduction <add>, %73, %cst_34 [1] : vector<2x64xf32> to vector<2xf32>
    %75 = vector.shape_cast %74 : vector<2xf32> to vector<2x1xf32>
    %76 = vector.shape_cast %75 : vector<2x1xf32> to vector<2x1xf32>
    %77 = vector.broadcast %76 : vector<2x1xf32> to vector<2x64xf32>
    %78 = vector.broadcast %66 : vector<1x64xf32> to vector<2x64xf32>
    %79 = arith.addf %77, %78 : vector<2x64xf32>
    %80 = tpu.concatenate %32, %79 in 1 : vector<2x64xf32>, vector<2x64xf32> -> vector<2x128xf32>
    %c0_35 = arith.constant 0 : index
    %c0_36 = arith.constant 0 : index
    %81 = vector.load %arg5[%c0_35, %c0_36] : memref<2x128xf32, #tpu.memory_space<vmem>>, vector<2x128xf32>
    tpu.vector_store %arg5[%c0_35, %c0_36], %80 {strides = array<i32>} : memref<2x128xf32, #tpu.memory_space<vmem>>, vector<2x128xf32>,
    return
  }
}

</mosaic_0001>

<bundles_post_ra>
// kernel: tpu_custom_call.1
= control target key start
LH: loop header
LB: loop body
LE: loop exit
PB: predicated region body
PF: predicated region fallthrough
CT: control target
= control target key end

     0   :  { %v793_v3 = vmov 0.0|0.0   ;;  %vm794_vm0 = vmmov 0   ;;  %v795_v6 = vmov 0.0   ;;  %s1047_s0 = inlined_call_operand.vmem [shape: f32[2,128], index: 0, kind: input, shape index: {}]   ;;  %s1048_s1 = inlined_call_operand.vmem [shape: f32[2,8,64], index: 1, kind: input, shape index: {}]   ;;  %s1049_s2 = inlined_call_operand.vmem [shape: f32[2,8,64], index: 2, kind: input, shape index: {}]   ;;  %s1050_s3 = inlined_call_operand.vmem [shape: f32[136,128], index: 3, kind: input, shape index: {}]   ;;  %s1051_s4 = inlined_call_operand.vmem [shape: f32[200,64], index: 4, kind: input, shape index: {}]   ;;  %s1052_s5 = inlined_call_operand.hbm [shape: f32[2,128], index: 5, kind: output, shape index: {}]  }
   0x1   :  { %v22_v0 = vld [vmem:[%s1050_s3] sm:$0xff]  ;;  %v23_v1 = vld [vmem:[%s1050_s3 + $0x8] sm:$0xff]  ;;  %v24_v2 = vld [vmem:[%s1050_s3 + $0x10] sm:$0xff]  ;;  %686 = vmatprep.subr.bf16.mxu0 %v793_v3  ;;  %626 = vmatprep.mubr.msk.f32.mxu0 %vm794_vm0, %v795_v6 }
   0x2   :  { %v687_v4 = vpack.c.bf16 %v23_v1, %v22_v0  ;;  %v25_v5 = vld [vmem:[%s1050_s3 + $0x18] sm:$0xff]  ;;  %710 = vmatprep.subr.bf16.mxu1 %v793_v3  ;;  %645 = vmatprep.mubr.msk.f32.mxu1 %vm794_vm0, %v795_v6  ;;  %v26_v8 = vld [vmem:[%s1050_s3 + $0x20] sm:$0xff]  ;;  %v27_v9 = vld [vmem:[%s1050_s3 + $0x28] sm:$0xff] }
   0x3   :  { %v690_v7 = vpack.c.bf16 %v25_v5, %v24_v2 }
   0x4   :  { %688 = vmatpush3.bf16.msra.mxu0 %v687_v4 }
   0x5   :  { %689 = vmatprep.subr.bf16.mxu0 %v793_v3 }
   0x6   :  { %10 = vsyncpa [#allocation3], 0  ;;  %v693_v10 = vpack.c.bf16 %v27_v9, %v26_v8  ;;  %v28_v11 = vld [vmem:[%s1050_s3 + $0x30] sm:$0xff]  ;;  %v29_v12 = vld [vmem:[%s1050_s3 + $0x38] sm:$0xff]  ;;  %s797_s6 = smov 32   ;;  %vm143_vm1 = vcmask 261120  }
   0x7   :  { %v696_v13 = vpack.c.bf16 %v29_v12, %v28_v11  ;;  %v30_v14 = vld [vmem:[%s1050_s3 + $0x40] sm:$0xff]  ;;  %v31_v15 = vld [vmem:[%s1050_s3 + $0x48] sm:$0xff]  ;;  %v32_v17 = vld [vmem:[%s1050_s3 + $0x50] sm:$0xff]  ;;  %vm159_vm2 = vcmask 523264   ;;  %v798_v8 = vmov 1966171168  }
   0x8   :  { %691 = vmatpush3.bf16.msra.mxu0 %v690_v7  ;;  %v699_v16 = vpack.c.bf16 %v31_v15, %v30_v14  ;;  %v33_v18 = vld [vmem:[%s1050_s3 + $0x58] sm:$0xff]  ;;  %v34_v20 = vld [vmem:[%s1050_s3 + $0x60] sm:$0xff]  ;;  %v35_v21 = vld [vmem:[%s1050_s3 + $0x68] sm:$0xff]  ;;  %v237_v9 = vunpack.c.l.s4 %v798_v8  ;;  %vm357_vm3 = vcmask 1041409   ;;  %vm511_vm4 = vcmask 517120   ;;  %s799_s18 = smov [#allocation2]  }
   0x9   :  { %692 = vmatprep.subr.bf16.mxu0 %v793_v3  ;;  %v702_v19 = vpack.c.bf16 %v33_v18, %v32_v17  ;;  %v705_v22 = vpack.c.bf16 %v35_v21, %v34_v20  ;;  %v36_v23 = vld [vmem:[%s1050_s3 + $0x70] sm:$0xff]  ;;  %v37_v24 = vld [vmem:[%s1050_s3 + $0x78] sm:$0xff]  ;;  %v21_v26 = vld [vmem:[%s1047_s0] sm:$0x3]  ;;  %s796_s0 = smov 64   ;;  %s532_s19 = sshll.u32 %s799_s18, 4  ;;  %s533_s19 = int_to_ptr.vmem [resolvable:$true] %s532_s19 }
   0xa   :  { %v708_v25 = vpack.c.bf16 %v37_v24, %v36_v23  ;;  %v540_v27 = vld [vmem:[%s1050_s3 + $0x80] ss:$0 sm:$0xff]  ;;  %v541_v28 = vld [vmem:[%s1050_s3 + $0x81] ss:$0 sm:$0xff]  ;;  %v146_v42 = vld [vmem:[%s1051_s4 + $0x8] sm:$0xff]  ;;  %v238_v11 = vunpack.c.0.s8 %v237_v9  ;;  %p774_p1 = scmp.lt.s32.totalorder %s533_s19, %s533_s19 }
   0xb   :  { %v145_v41 = vld [vmem:[%s1051_s4] sm:$0xff]  ;;  %v337_v45 = vld [vmem:[%s1051_s4 + $0x48] sm:$0xff]  ;;  %v147_v46 = vld [vmem:[%s1051_s4 + $0x10] sm:$0xff] }
   0xc   :  { %694 = vmatpush3.bf16.msra.mxu0 %v693_v10  ;;  %v336_v43 = vld [vmem:[%s1051_s4 + $0x40] sm:$0xff]  ;;  %v711_v44 = vpack.c.bf16 %v146_v42, %v145_v41  ;;  %v148_v47 = vld [vmem:[%s1051_s4 + $0x18] sm:$0xff]  ;;  %v338_v49 = vld [vmem:[%s1051_s4 + $0x50] sm:$0xff]  ;;  %v239_v10 = vlaneseq }
   0xd   :  { %695 = vmatprep.subr.bf16.mxu0 %v793_v3  ;;  %v735_v48 = vpack.c.bf16 %v337_v45, %v336_v43  ;;  %v339_v50 = vld [vmem:[%s1051_s4 + $0x58] sm:$0xff]  ;;  %v714_v51 = vpack.c.bf16 %v148_v47, %v147_v46  ;;  %v149_v53 = vld [vmem:[%s1051_s4 + $0x20] sm:$0xff]  ;;  %v150_v54 = vld [vmem:[%s1051_s4 + $0x28] sm:$0xff] }
   0xe   :  { %712 = vmatpush3.bf16.msra.mxu1 %v711_v44  ;;  %v738_v52 = vpack.c.bf16 %v339_v50, %v338_v49  ;;  %v340_v55 = vld [vmem:[%s1051_s4 + $0x60] sm:$0xff]  ;;  %v341_v56 = vld [vmem:[%s1051_s4 + $0x68] sm:$0xff]  ;;  %v717_v57 = vpack.c.bf16 %v150_v54, %v149_v53  ;;  %v151_v59 = vld [vmem:[%s1051_s4 + $0x30] sm:$0xff]  ;;  %v240_v12 = vshrl.u32 %v239_v10, 7 }
   0xf   :  { %713 = vmatprep.subr.bf16.mxu1 %v793_v3  ;;  %v741_v58 = vpack.c.bf16 %v341_v56, %v340_v55  ;;  %v152_v60 = vld [vmem:[%s1051_s4 + $0x38] sm:$0xff]  ;;  %v342_v61 = vld [vmem:[%s1051_s4 + $0x70] sm:$0xff]  ;;  %v233_v23 = vld [vmem:[%s1049_s2] sm:$0xff] }
  0x10   :  { %697 = vmatpush3.bf16.msra.mxu0 %v696_v13  ;;  %v343_v62 = vld [vmem:[%s1051_s4 + $0x78] sm:$0xff]  ;;  %v720_v0 = vpack.c.bf16 %v152_v60, %v151_v59  ;;  %v542_v13 = vld [vmem:[%s1051_s4 + $0xc0] ss:$0 sm:$0xff]  ;;  %v241_v14 = vsub.s32 %v238_v11, %v240_v12  ;;  %v260_v21 = vsub.s32 0, %v240_v12  ;;  %v349_v44 = vld [vmem:[%s1051_s4 + $0xa8] sm:$0xff] }
  0x11   :  { %698 = vmatprep.subr.bf16.mxu0 %v793_v3  ;;  %v744_v1 = vpack.c.bf16 %v343_v62, %v342_v61  ;;  %v347_v41 = vld [vmem:[%s1051_s4 + $0x98] sm:$0xff]  ;;  %v348_v43 = vld [vmem:[%s1051_s4 + $0xa0] sm:$0xff]  ;;  %v350_v46 = vld [vmem:[%s1051_s4 + $0xb0] sm:$0xff] }
  0x12   :  { %715 = vmatpush3.bf16.msra.mxu1 %v714_v51  ;;  %v729_v45 = vpack.c.bf16 %v349_v44, %v348_v43  ;;  %v351_v47 = vld [vmem:[%s1051_s4 + $0xb8] sm:$0xff] }
  0x13   :  { %716 = vmatprep.subr.bf16.mxu1 %v793_v3 }
  0x14   :  { %700 = vmatpush3.bf16.msra.mxu0 %v699_v16 }
  0x15   :  { %701 = vmatprep.subr.bf16.mxu0 %v793_v3 }
  0x16   :  { %718 = vmatpush3.bf16.msra.mxu1 %v717_v57 }
  0x17   :  { %719 = vmatprep.subr.bf16.mxu1 %v793_v3 }
  0x18   :  { %703 = vmatpush3.bf16.msra.mxu0 %v702_v19 }
  0x19   :  { %704 = vmatprep.subr.bf16.mxu0 %v793_v3 }
  0x1a   :  { %721 = vmatpush3.bf16.msra.mxu1 %v720_v0 }
  0x1b   :  { %722 = vmatprep.subr.bf16.mxu1 %v793_v3 }
  0x1c   :  { %706 = vmatpush3.bf16.msra.mxu0 %v705_v22 }
  0x1d   :  { %707 = vmatprep.subr.bf16.mxu0 %v793_v3 }
  0x20   :  { %709 = vmatpush3.bf16.msra.mxu0 %v708_v25 }
  0x21   :  { %734 = vmatprep.subr.bf16.mxu0 %v793_v3 }
  0x23   :  { %627 = vmatmul.mubr.f32.vlgmr.msra.gmra.mrb[0].mxu0 %v21_v26 }
  0x24   :  { %683 = vmatprep.mubr.msk.f32.mxu0 %vm794_vm0, %v795_v6  ;;  %736 = vmatpush3.bf16.msra.mxu0 %v735_v48  ;;  %v732_v48 = vpack.c.bf16 %v351_v47, %v350_v46  ;;  %v548_v46 = vld [vmem:[%s1051_s4 + $0xc3] ss:$0 sm:$0xff] }
  0x25   :  { %737 = vmatprep.subr.bf16.mxu0 %v793_v3 }
  0x28   :  { %739 = vmatpush3.bf16.msra.mxu0 %v738_v52 }
  0x29   :  { %740 = vmatprep.subr.bf16.mxu0 %v793_v3 }
  0x2c   :  { %742 = vmatpush3.bf16.msra.mxu0 %v741_v58 }
  0x2d   :  { %743 = vmatprep.subr.bf16.mxu0 %v793_v3 }
  0x30   :  { %745 = vmatpush3.bf16.msra.mxu0 %v744_v1 }
  0xf6   :  { %v110_v29 = vpop.f32.mrb[0].mxu0 }
  0xf7   :  { %v111_v30 = vadd.f32 %v540_v27, %v110_v29  ;;  %v628_v31 = vpop.f32.mrb[1].mxu0 }
  0xf9   :  { %v118_v32 = vmul.f32 %v541_v28, %v111_v30  ;;  %v544_v30 = vld [vmem:[%s1051_s4 + $0xc1] ss:$0 sm:$0xff] }
  0xfb   :  { %753 = vtanh.f32 %v118_v32 }
 0x105   :  { %v754_v33 = vpop.eup %753 }
 0x106   :  { %124 = vrot.lane.b32.xlu0 %v754_v33, %s796_s0  ;;  %v120_v34 = vadd.f32 1.0, %v754_v33 }
 0x108   :  { %v121_v35 = vmul.f32 0.5, %v120_v34 }
 0x10a   :  { %v122_v38 = vmul.f32 %v121_v35, %v21_v26  ;;  %v234_v26 = vld [vmem:[%s1049_s2 + $0x8] sm:$0xff]  ;;  %s769_s2 = scalar_lea.vmem %s533_s19, 32 }
 0x10b   :  { %p770_p0 = scmp.ne.s32.totalorder %s533_s19, %s769_s2  ;;  %p775_p2 = scmp.lt.s32.totalorder %s769_s2, %s769_s2 }
 0x10d   :  { %p776_p3 = por %p775_p2, %p774_p1 }
 0x10f   :  { %p777_p4 = pnand %p776_p3, %p770_p0 }
 0x178   :  { %v125_v36 = vpop.permute.xlu0 %124 }
 0x179   :  { %v127_v37 = vmul.f32 %v125_v36, %v121_v35 }
 0x17b   :  { %129 = vrot.lane.b32.xlu0 %v127_v37, %s797_s6  ;;  %v344_v37 = vld [vmem:[%s1051_s4 + $0x80] sm:$0xff] }
 0x1ed   :  { %v130_v39 = vpop.permute.xlu0 %129 }
 0x1ee   :  { %v132_v40 = vadd.f32 %v130_v39, %v122_v38  ;;  %v345_v38 = vld [vmem:[%s1051_s4 + $0x88] sm:$0xff]  ;;  %v346_v39 = vld [vmem:[%s1051_s4 + $0x90] sm:$0xff] }
 0x1ef   :  { %v726_v42 = vpack.c.bf16 %v347_v41, %v346_v39 }
 0x1f0   :  { %755 = vtanh.f32 %v132_v40 }
 0x1fa   :  { %v756_v63 = vpop.eup %755 }
 0x1fb   :  { %135 = vrot.lane.b32.xlu1 %v756_v63, %s796_s0 }
 0x26d   :  { %v136_v2 = vpop.permute.xlu1 %135 }
 0x26e   :  { %v138_v4 = vmul.f32 %v136_v2, %v121_v35  ;;  %v314_v2 = vld [vmem:[%s1048_s1] sm:$0xff] }
 0x270   :  { %140 = vrot.lane.b32.xlu1 %v138_v4, %s797_s6 }
 0x2e2   :  { %v141_v5 = vpop.permute.xlu1 %140 }
 0x2e3   :  { %v962_v7 = vsel %vm143_vm1, %v141_v5, %v132_v40  ;;  %v723_v40 = vpack.c.bf16 %v345_v38, %v344_v37  ;;  %v315_v5 = vld [vmem:[%s1048_s1 + $0x8] sm:$0xff] }
 0x2e4   :  { %646 = vmatmul.mubr.msk.f32.vlgmr.msra.gmra.mrb[0].mxu1 %vm159_vm2, %v962_v7  ;;  %684 = vmatmul.mubr.msk.f32.vlgmr.msra.gmra.mrb[2].mxu0 %vm159_vm2, %v962_v7 }
 0x2e5   :  { %664 = vmatprep.mubr.msk.f32.mxu1 %vm794_vm0, %v795_v6  ;;  %724 = vmatpush3.bf16.msra.mxu1 %v723_v40 }
 0x2e6   :  { %725 = vmatprep.subr.bf16.mxu1 %v793_v3 }
 0x2e9   :  { %727 = vmatpush3.bf16.msra.mxu1 %v726_v42  ;;  %v547_v42 = vld [vmem:[%s1051_s4 + $0xc2] ss:$0 sm:$0xff] }
 0x2ea   :  { %728 = vmatprep.subr.bf16.mxu1 %v793_v3 }
 0x2ed   :  { %730 = vmatpush3.bf16.msra.mxu1 %v729_v45 }
 0x2ee   :  { %731 = vmatprep.subr.bf16.mxu1 %v793_v3 }
 0x2f1   :  { %733 = vmatpush3.bf16.msra.mxu1 %v732_v48 }
 0x3b7   :  { %v229_v15 = vpop.f32.mrb[0].mxu1  ;;  %v973_v16 = vpop.f32.mrb[2].mxu0 }
 0x3b8   :  { %v230_v17 = vadd.f32 %v542_v13, %v229_v15  ;;  %v647_v18 = vpop.f32.mrb[1].mxu1  ;;  %v685_v19 = vpop.f32.mrb[3].mxu0 }
 0x3ba   :  { %v242_v20 = vrot.slane %v230_v17, %v241_v14 }
 0x3bc   :  { %v243_v22 = vcombine.high %v242_v20, %v242_v20  ;;  %v250_v6 = vrot.slane %v242_v20, %v241_v14 }
 0x3be   :  { %v257_v24 = vrot.slane %v243_v22, %v241_v14  ;;  %v261_v25 = vrot.slane %v250_v6, %v260_v21 }
 0x3c0   :  { %v265_v27 = vrot.slane %v257_v24, %v260_v21  ;;  %v268_v28 = vadd.f32 %v261_v25, %v233_v23 }
 0x3c2   :  { %v269_v29 = vadd.f32 %v265_v27, %v234_v26  ;;  %757 = vtanh.f32 %v268_v28 }
 0x3c4   :  { %759 = vtanh.f32 %v269_v29 }
 0x3cc   :  { %v758_v31 = vpop.eup %757 }
 0x3cd   :  { %v276_v32 = vmul.f32 %v758_v31, %v544_v30 }
 0x3ce   :  { %v760_v33 = vpop.eup %759 }
 0x3cf   :  { %v278_v34 = vsel %vm159_vm2, %v276_v32, 0.0  ;;  %v277_v35 = vmul.f32 %v760_v33, %v544_v30 }
 0x3d0   :  { %279 = vadd.xlane.f32.xlu0 %v278_v34 }
 0x3d1   :  { %v281_v36 = vsel %vm159_vm2, %v277_v35, 0.0 }
 0x3d2   :  { %282 = vadd.xlane.f32.xlu1 %v281_v36 }
 0x45d   :  { %v280_v49 = vpop.xlane.xlu0 %279 }
 0x45e   :  { %v284_v50 = vrot.slane %v280_v49, 4 }
 0x45f   :  { %v283_v51 = vpop.xlane.xlu1 %282 }
 0x460   :  { %v285_v52 = vmax.f32 %v280_v49, %v284_v50  ;;  %v290_v53 = vrot.slane %v283_v51, 4  ;;  %v549_v50 = vld [vmem:[%s1051_s4 + $0xc4] ss:$0 sm:$0xff] }
 0x462   :  { %v286_v54 = vrot.slane %v285_v52, 2  ;;  %v291_v55 = vmax.f32 %v283_v51, %v290_v53 }
 0x464   :  { %v287_v56 = vmax.f32 %v285_v52, %v286_v54  ;;  %v292_v57 = vrot.slane %v291_v55, 2 }
 0x466   :  { %v288_v58 = vrot.slane %v287_v56, 1  ;;  %v293_v59 = vmax.f32 %v291_v55, %v292_v57 }
 0x468   :  { %v289_v60 = vmax.f32 %v287_v56, %v288_v58  ;;  %v294_v61 = vrot.slane %v293_v59, 1 }
 0x46a   :  { %v296_v62 = vsub.f32 %v280_v49, %v289_v60  ;;  %v295_v63 = vmax.f32 %v293_v59, %v294_v61 }
 0x46c   :  { %v298_v0 = vmul.f32 1.442695, %v296_v62  ;;  %v297_v1 = vsub.f32 %v283_v51, %v295_v63 }
 0x46e   :  { %761 = vpow2.f32 %v298_v0  ;;  %v300_v3 = vmul.f32 1.442695, %v297_v1 }
 0x470   :  { %763 = vpow2.f32 %v300_v3 }
 0x478   :  { %v762_v4 = vpop.eup %761 }
 0x479   :  { %v302_v8 = vrot.slane %v762_v4, 4  ;;  %v316_v9 = vmul.f32 %v762_v4, %v314_v2 }
 0x47a   :  { %v764_v10 = vpop.eup %763 }
 0x47b   :  { %v308_v11 = vrot.slane %v764_v10, 4  ;;  %v303_v12 = vadd.f32 %v762_v4, %v302_v8  ;;  %v317_v13 = vmul.f32 %v764_v10, %v315_v5  ;;  %v318_v14 = vsel %vm159_vm2, %v316_v9, 0.0 }
 0x47c   :  { %v319_v15 = vrot.slane %v318_v14, 4 }
 0x47d   :  { %v304_v17 = vrot.slane %v303_v12, 2  ;;  %v309_v18 = vadd.f32 %v764_v10, %v308_v11  ;;  %v325_v19 = vsel %vm159_vm2, %v317_v13, 0.0 }
 0x47e   :  { %v326_v20 = vrot.slane %v325_v19, 4  ;;  %v320_v6 = vadd.f32 %v319_v15, %v318_v14 }
 0x47f   :  { %v305_v21 = vadd.f32 %v304_v17, %v303_v12  ;;  %v310_v22 = vrot.slane %v309_v18, 2 }
 0x480   :  { %v327_v23 = vadd.f32 %v326_v20, %v325_v19  ;;  %v321_v28 = vrot.slane %v320_v6, 2 }
 0x481   :  { %v306_v24 = vrot.slane %v305_v21, 1  ;;  %v311_v25 = vadd.f32 %v310_v22, %v309_v18 }
 0x482   :  { %v328_v29 = vrot.slane %v327_v23, 2  ;;  %v322_v31 = vadd.f32 %v321_v28, %v320_v6 }
 0x483   :  { %v307_v26 = vadd.f32 %v306_v24, %v305_v21  ;;  %v312_v27 = vrot.slane %v311_v25, 1 }
 0x484   :  { %v329_v32 = vadd.f32 %v328_v29, %v327_v23  ;;  %v323_v33 = vrot.slane %v322_v31, 1 }
 0x485   :  { %v313_v30 = vadd.f32 %v312_v27, %v311_v25  ;;  %765 = vrcp.f32 %v307_v26 }
 0x486   :  { %v330_v34 = vrot.slane %v329_v32, 1  ;;  %v324_v36 = vadd.f32 %v323_v33, %v322_v31 }
 0x487   :  { %767 = vrcp.f32 %v313_v30 }
 0x488   :  { %v331_v37 = vadd.f32 %v330_v34, %v329_v32 }
 0x48f   :  { %v766_v35 = vpop.eup %765 }
 0x490   :  { %v334_v39 = vmul.f32 %v766_v35, %v324_v36 }
 0x491   :  { %v768_v38 = vpop.eup %767 }
 0x492   :  { %v335_v40 = vmul.f32 %v768_v38, %v331_v37 }
 0x494   :  { %v358_v41 = vsel %vm357_vm3, %v335_v40, %v334_v39 }
 0x495   :  { %665 = vmatmul.mubr.msk.f32.vlgmr.msra.gmra.mrb[2].mxu1 %vm159_vm2, %v358_v41 }
 0x568   :  { %v427_v43 = vpop.f32.mrb[2].mxu1 }
 0x569   :  { %v498_v44 = vadd.f32 %v973_v16, %v427_v43  ;;  %v666_v45 = vpop.f32.mrb[3].mxu1 }
 0x56b   :  { %v505_v47 = vadd.f32 %v547_v42, %v498_v44 }
 0x56d   :  { %v510_v48 = vmul.f32 %v548_v46, %v505_v47 }
 0x56f   :  { %v512_v49 = vsel %vm511_vm4, %v510_v48, 0.0 }
 0x570   :  { %513 = vadd.xlane.f32.xlu0 %v512_v49 }
 0x5fd   :  { %v514_v51 = vpop.xlane.xlu0 %513 }
 0x5fe   :  { %v519_v52 = vadd.f32 %v549_v50, %v514_v51 }
 0x600   :  { %521 = vrot.lane.b32.xlu0 %v519_v52, %s796_s0 }
 0x672   :  { %v522_v16 = vpop.permute.xlu0 %521 }
 0x673   :  { %v524_v53 = vsel %vm159_vm2, %v962_v7, %v522_v16 }
 0x674   :  { %525 = vst [vmem:[#allocation2] sm:$0x3] %v524_v53 }
 0x675   :  { %780 = shalt.err (!%p777_p4)
}
 0x676   :  { %s781_s21 = scalar_lea.hbm %s1052_s5, 32 }
 0x677   :  { %p782_p5 = scmp.ne.s32.totalorder %s1052_s5, %s781_s21  ;;  %p785_p6 = scmp.lt.u32.totalorder %s781_s21, %s1052_s5 }
 0x679   :  { %p787_p7 = pnand %p785_p6, %p782_p5 }
 0x67b   :  { %790 = shalt.err (!%p787_p7)
}
 0x67c   :  { %535 = dma.vmem_to_hbm [thread:$0]  %s533_s19, 32, %s1052_s5, [#allocation3]  }
 0x67d   :  { %791 = dma.done.wait [#allocation3], 32  }
 0x67e   :  { %792 = vsyncadd [#allocation3], 4294967264 }
 0x67f   :  { %539 = vsyncpa [#allocation3], 1 }

</bundles_post_ra>
